<compile_context>
chip_gen: v6e
topology: v6e:2x2x1
jax: 0.10.0
libtpu: 0.0.40
codegen_flags: <defaults>
</compile_context>

<pallas_src>
import jax
import jax.numpy as jnp
from jax.experimental import pallas as pl
from jax.experimental.pallas import tpu as pltpu


def _chomp_copy_kernel(x_ref, o_ref):
    # Fast path: input block already excludes the chomped tail.
    o_ref[...] = x_ref[...]


def _chomp_slice_kernel(x_ref, o_ref):
    # Fallback path: full-L input block, static slice to the output width.
    l_out = o_ref.shape[-1]
    o_ref[...] = x_ref[:, :l_out]


def _sublane(dtype) -> int:
    # Sublane packing: 8 for 4-byte, 16 for 2-byte, 32 for 1-byte dtypes.
    itemsize = jnp.dtype(dtype).itemsize
    return max(8, 32 // itemsize)


def chomp1d(x: jax.Array, chomp_size: int) -> jax.Array:
    """Pallas equivalent of Chomp1d.forward: x[:, :, :-chomp_size].contiguous()."""
    assert x.ndim == 3, "expected [N, C, L]"
    n, c, l = x.shape
    assert 0 < chomp_size < l, "chomp_size must be in (0, L)"
    l_out = l - chomp_size

    rows = n * c
    x2 = x.reshape(rows, l)

    itemsize = jnp.dtype(x.dtype).itemsize
    sub = _sublane(x.dtype)

    # Row-tile size: target ~1 MiB per input block, rounded to a sublane
    # multiple; if that covers all rows just take the full row extent
    # (full-dim blocks always satisfy the (8,128) rule).
    target_rows = max(1, (1 << 20) // max(1, l * itemsize))
    tm = max(sub, (target_rows // sub) * sub)
    if tm >= rows:
        tm = rows
    grid = (pl.cdiv(rows, tm),)

    if l_out % 128 == 0:
        # Lane-aligned: only DMA the first l_out columns; pure copy kernel.
        kernel = _chomp_copy_kernel
        in_spec = pl.BlockSpec((tm, l_out), lambda i: (i, 0))
    else:
        # Unaligned l_out: full-L input block (last dim == full array dim),
        # slice inside the kernel.
        kernel = _chomp_slice_kernel
        in_spec = pl.BlockSpec((tm, l), lambda i: (i, 0))

    out_spec = pl.BlockSpec((tm, l_out), lambda i: (i, 0))

    y2 = pl.pallas_call(
        kernel,
        out_shape=jax.ShapeDtypeStruct((rows, l_out), x.dtype),
        grid_spec=pltpu.PrefetchScalarGridSpec(
            num_scalar_prefetch=0,
            grid=grid,
            in_specs=[in_spec],
            out_specs=out_spec,
        ),
        compiler_params=pltpu.CompilerParams(
            dimension_semantics=("parallel",),
        ),
    )(x2)

    return y2.reshape(n, c, l_out)


if __name__ == "__main__":
    key = jax.random.PRNGKey(0)

    # Case 1: small TCN-like shape, l_out not 128-aligned -> fallback path.
    chomp_size = 4
    N, C, L = 2, 4, 16
    x = jax.random.normal(key, (N, C, L), dtype=jnp.float32)
    y = jax.block_until_ready(chomp1d(x, chomp_size))
    y_ref = x[:, :, :-chomp_size]
    assert y.shape == (N, C, L - chomp_size), y.shape
    assert y.dtype == x.dtype
    assert jnp.array_equal(y, y_ref), "mismatch vs reference slice (fallback path)"

    # Case 2: l_out == 128 -> lane-aligned fast path (no tail DMA).
    chomp_size2 = 4
    L2 = 132
    x2 = jax.random.normal(jax.random.PRNGKey(0), (N, C, L2), dtype=jnp.float32)
    y2 = jax.block_until_ready(chomp1d(x2, chomp_size2))
    y2_ref = x2[:, :, :-chomp_size2]
    assert y2.shape == (N, C, L2 - chomp_size2), y2.shape
    assert jnp.array_equal(y2, y2_ref), "mismatch vs reference slice (fast path)"

    print("KERNEL_OK")
</pallas_src>

<mosaic_0001>
module attributes {stable_mosaic.version = 11 : i64} {
  func.func @_chomp_slice_kernel(%arg0: i32, %arg1: memref<8x16xf32, #tpu.memory_space<vmem>>, %arg2: memref<8x12xf32, #tpu.memory_space<vmem>>) attributes {dimension_semantics = [#tpu.dimension_semantics<parallel>], iteration_bounds = array<i64: 1>, scalar_prefetch = 0 : i64, scratch_operands = 0 : i64, tpu.core_type = #tpu.core_type<tc>, window_params = [{transform_indices = @transform_0, window_bounds = array<i64: 8, 16>}, {transform_indices = @transform_1, window_bounds = array<i64: 8, 12>}]} {
    %c0 = arith.constant 0 : index
    %c0_0 = arith.constant 0 : index
    %0 = vector.load %arg1[%c0, %c0_0] : memref<8x16xf32, #tpu.memory_space<vmem>>, vector<8x12xf32>
    %c0_1 = arith.constant 0 : index
    %c0_2 = arith.constant 0 : index
    %1 = vector.load %arg2[%c0_1, %c0_2] : memref<8x12xf32, #tpu.memory_space<vmem>>, vector<8x12xf32>
    tpu.vector_store %arg2[%c0_1, %c0_2], %0 {strides = array<i32>} : memref<8x12xf32, #tpu.memory_space<vmem>>, vector<8x12xf32>,
    return
  }
  func.func @transform_0(%arg0: i32) -> (i32, i32) {
    %c0_i32 = arith.constant 0 : i32
    %c0_i32_0 = arith.constant 0 : i32
    return %arg0, %c0_i32 : i32, i32
  }
  func.func @transform_1(%arg0: i32) -> (i32, i32) {
    %c0_i32 = arith.constant 0 : i32
    %c0_i32_0 = arith.constant 0 : i32
    return %arg0, %c0_i32 : i32, i32
  }
}

</mosaic_0001>

<bundles_post_ra>
// kernel: tpu_custom_call.1
= control target key start
LH: loop header
LB: loop body
LE: loop exit
PB: predicated region body
PF: predicated region fallthrough
CT: control target
= control target key end

     0   :  { %6 = vsyncpa [#allocation3], 0  ;;  %s103_s0 = inlined_call_operand.hbm [shape: f32[8,16], index: 0, kind: input, shape index: {}]   ;;  %s104_s1 = inlined_call_operand.hbm [shape: f32[8,12], index: 1, kind: output, shape index: {}]  }
   0x1   :  { %7 = vsyncpa [#allocation4], 0  ;;  %s85_s6 = smov [#allocation2]  }
   0x2   :  { %s14_s7 = sshll.u32 %s85_s6, 4  ;;  %s15_s7 = int_to_ptr.vmem [resolvable:$true] %s14_s7 }
   0x3   :  { %s49_s8 = scalar_lea.vmem %s15_s7, 128  ;;  %p54_p1 = scmp.lt.s32.totalorder %s15_s7, %s15_s7 }
   0x4   :  { %p50_p0 = scmp.ne.s32.totalorder %s15_s7, %s49_s8  ;;  %p55_p2 = scmp.lt.s32.totalorder %s49_s8, %s49_s8 }
   0x6   :  { %p56_p3 = por %p55_p2, %p54_p1 }
   0x8   :  { %p57_p4 = pnand %p56_p3, %p50_p0 }
   0xa   :  { %60 = shalt.err (!%p57_p4)
}
   0xb   :  { %17 = dma.hbm_to_vmem [thread:$0]  %s103_s0, 128, %s15_s7, [#allocation3]  }
   0xc   :  { %81 = dma.done.wait [#allocation3], 128  }
   0xd   :  { %82 = vsyncadd [#allocation3], 4294967168  ;;  %s86_s11 = smov [#allocation5]   ;;  %vm22_vm0 = vcmask 97280   ;;  %v21_v0 = vld [vmem:[#allocation2] sm:$0xff] }
   0xe   :  { %s30_s12 = sshll.u32 %s86_s11, 4  ;;  %23 = vst.msk [vmem:[#allocation5] sm:$0xff] %vm22_vm0, %v21_v0  ;;  %s31_s12 = int_to_ptr.vmem [resolvable:$true] %s30_s12 }
   0xf   :  { %s61_s13 = scalar_lea.vmem %s31_s12, 128  ;;  %p66_p6 = scmp.lt.s32.totalorder %s31_s12, %s31_s12 }
  0x10   :  { %p62_p5 = scmp.ne.s32.totalorder %s31_s12, %s61_s13  ;;  %p67_p7 = scmp.lt.s32.totalorder %s61_s13, %s61_s13 }
  0x12   :  { %p68_p8 = por %p67_p7, %p66_p6 }
  0x14   :  { %p69_p9 = pnand %p68_p8, %p62_p5 }
  0x16   :  { %72 = shalt.err (!%p69_p9)
}
  0x17   :  { %33 = dma.vmem_to_hbm [thread:$0]  %s31_s12, 128, %s104_s1, [#allocation4]  }
  0x18   :  { %83 = dma.done.wait [#allocation4], 128  }
  0x19   :  { %84 = vsyncadd [#allocation4], 4294967168 }
  0x1a   :  { %37 = vsyncpa [#allocation3], 1 }
  0x1b   :  { %38 = vsyncpa [#allocation4], 1 }

</bundles_post_ra>
